<compile_context>
chip_gen: v7x
topology: tpu7x:2x2x1
jax: 0.10.0
libtpu: 0.0.40
codegen_flags: <defaults>
</compile_context>

<pallas_src>
import jax
import jax.numpy as jnp
from jax.experimental import pallas as pl
from jax.experimental.pallas import tpu as pltpu


def _round_up(x: int, m: int) -> int:
    return ((x + m - 1) // m) * m


def _choose_batch_tile(B: int, D: int, O_pad: int, budget_bytes: int) -> int:
    """Largest sublane-aligned batch tile whose double-buffered working set fits
    the VMEM budget, capped so the grid keeps >=4 steps when possible."""
    # Auto-pipelining double-buffers every operand (W/bias are fetched once
    # because their index_map is constant, but still get 2 buffers; the extra
    # D*O_pad*4 bytes are negligible here -- pl.Buffered(1) could reclaim them
    # for very large D).
    fixed = 2 * D * O_pad * 4 + 2 * O_pad * 4          # W + bias (f32)
    per_row = 2 * D * 4 + 2 * O_pad * 4                # x block + out block per row (f32)
    tb_vmem = max(8, (budget_bytes - fixed) // per_row)
    tb_vmem = (tb_vmem // 8) * 8

    if B <= 8:
        return B                                       # block == full batch dim
    tb_cores = _round_up(-(-B // 4), 8)                # aim for >=4 grid steps
    return int(max(8, min(tb_vmem, tb_cores)))


def _logreg_kernel(x_ref, w_ref, b_ref, o_ref):
    # x_ref: (TB, D) f32, w_ref: (D, O_pad) f32, b_ref: (1, O_pad) f32,
    # o_ref: (TB, O_pad) f32.
    logits = jnp.dot(x_ref[...], w_ref[...], preferred_element_type=jnp.float32)
    logits = logits + b_ref[...]                       # broadcast bias over batch tile
    # Exact sigmoid: exp on the EUP, exact divide (safe numerics at both tails).
    o_ref[...] = 1.0 / (1.0 + jnp.exp(-logits))


def logistic_regression(x_nchw, weight, bias, *, vmem_budget_bytes=32 << 20):
    """
    x_nchw: (B, C, H, W) float32
    weight: (out_dim, in_dim) float32   (PyTorch nn.Linear layout)
    bias:   (out_dim,) float32
    returns (B, out_dim) float32  ==  sigmoid(flatten(x) @ weight.T + bias)
    """
    B = x_nchw.shape[0]
    x2d = x_nchw.reshape(B, -1)                        # metadata-only flatten (row-major NCHW)
    D = x2d.shape[1]
    out_dim, in_dim = weight.shape
    assert in_dim == D, (in_dim, D)

    # Lane-dense output: pad the feature dim to a multiple of 128.
    O_pad = _round_up(max(out_dim, 128), 128)

    # One-time, tiny weight/bias prep (O_pad x D elements; negligible vs streaming x).
    w_t = jnp.pad(weight.astype(jnp.float32), ((0, O_pad - out_dim), (0, 0))).T  # (D, O_pad)
    b_p = jnp.pad(bias.astype(jnp.float32), (0, O_pad - out_dim)).reshape(1, O_pad)

    TB = _choose_batch_tile(B, D, O_pad, vmem_budget_bytes)
    grid = (pl.cdiv(B, TB),)

    out_padded = pl.pallas_call(
        _logreg_kernel,
        out_shape=jax.ShapeDtypeStruct((B, O_pad), jnp.float32),
        grid=grid,
        in_specs=[
            pl.BlockSpec((TB, D), lambda i: (i, 0)),        # x: streamed over batch, native f32
            pl.BlockSpec((D, O_pad), lambda i: (0, 0)),     # W: constant block -> VMEM-resident
            pl.BlockSpec((1, O_pad), lambda i: (0, 0)),     # bias: VMEM-resident
        ],
        out_specs=pl.BlockSpec((TB, O_pad), lambda i: (i, 0)),
        compiler_params=pltpu.CompilerParams(
            dimension_semantics=("parallel",),              # shard batch axis over v7x's 2 TCs
            vmem_limit_bytes=48 << 20,                      # > default scoped limits, < v7x 64 MiB
        ),
    )(x2d, w_t, b_p)

    return out_padded[:, :out_dim]


if __name__ == "__main__":
    key = jax.random.PRNGKey(0)
    kx, kw, kb = jax.random.split(key, 3)

    # Small shapes: batch=2, channels=4, spatial=16 -> input_dim = 4*16*16 = 1024
    B, C, H, W = 2, 4, 16, 16
    input_dim = C * H * W
    output_dim = 8

    x = jax.random.normal(kx, (B, C, H, W), dtype=jnp.float32)
    # Deterministic init mimicking nn.Linear's uniform(-1/sqrt(D), 1/sqrt(D))
    bound = 1.0 / (input_dim ** 0.5)
    weight = jax.random.uniform(kw, (output_dim, input_dim),
                                minval=-bound, maxval=bound, dtype=jnp.float32)
    bias = jax.random.uniform(kb, (output_dim,),
                              minval=-bound, maxval=bound, dtype=jnp.float32)

    run = jax.jit(logistic_regression)
    out = jax.block_until_ready(run(x, weight, bias))
    assert out.shape == (B, output_dim)

    ref = jax.nn.sigmoid(x.reshape(B, -1) @ weight.T + bias)
    # Tolerance covers Mosaic's f32-matmul pass decomposition on the MXU; the
    # epilogue (exp + exact divide) is exact f32.
    assert jnp.allclose(out, ref, atol=5e-3, rtol=5e-3), float(jnp.max(jnp.abs(out - ref)))

    print("KERNEL_OK")
</pallas_src>

<mosaic_0001>
module attributes {stable_mosaic.version = 11 : i64} {
  func.func @_logreg_kernel(%arg0: i32, %arg1: memref<2x1024xf32, #tpu.memory_space<vmem>>, %arg2: memref<1024x128xf32, #tpu.memory_space<vmem>>, %arg3: memref<1x128xf32, #tpu.memory_space<vmem>>, %arg4: memref<2x128xf32, #tpu.memory_space<vmem>>) attributes {dimension_semantics = [#tpu.dimension_semantics<parallel>], iteration_bounds = array<i64: 1>, scalar_prefetch = 0 : i64, scratch_operands = 0 : i64, tpu.core_type = #tpu.core_type<tc>, window_params = [{transform_indices = @transform_0, window_bounds = array<i64: 2, 1024>}, {pipeline_mode = #tpu.pipeline_mode<synchronous>, transform_indices = @transform_1, window_bounds = array<i64: 1024, 128>}, {pipeline_mode = #tpu.pipeline_mode<synchronous>, transform_indices = @transform_2, window_bounds = array<i64: 1, 128>}, {transform_indices = @transform_3, window_bounds = array<i64: 2, 128>}]} {
    %c0 = arith.constant 0 : index
    %c0_0 = arith.constant 0 : index
    %0 = vector.load %arg1[%c0, %c0_0] : memref<2x1024xf32, #tpu.memory_space<vmem>>, vector<2x1024xf32>
    %c0_1 = arith.constant 0 : index
    %c0_2 = arith.constant 0 : index
    %1 = vector.load %arg2[%c0_1, %c0_2] : memref<1024x128xf32, #tpu.memory_space<vmem>>, vector<1024x128xf32>
    %cst = arith.constant dense<0.000000e+00> : vector<2x128xf32>
    %2 = tpu.matmul %0, %1, %cst {dimension_numbers = #tpu.dot_dimension_numbers<[1], [0], [0], [1], [0, 0, 1, 1], [], []>} : vector<2x1024xf32>, vector<1024x128xf32>, vector<2x128xf32> -> vector<2x128xf32>
    %c0_3 = arith.constant 0 : index
    %c0_4 = arith.constant 0 : index
    %3 = vector.load %arg3[%c0_3, %c0_4] : memref<1x128xf32, #tpu.memory_space<vmem>>, vector<1x128xf32>
    %4 = vector.broadcast %3 : vector<1x128xf32> to vector<2x128xf32>
    %5 = arith.addf %2, %4 : vector<2x128xf32>
    %cst_5 = arith.constant 0.000000e+00 : f32
    %6 = vector.broadcast %cst_5 : f32 to vector<2x128xf32>
    %7 = arith.subf %6, %5 : vector<2x128xf32>
    %8 = math.exp %7 : vector<2x128xf32>
    %cst_6 = arith.constant 1.000000e+00 : f32
    %9 = vector.broadcast %cst_6 : f32 to vector<2x128xf32>
    %10 = arith.addf %9, %8 : vector<2x128xf32>
    %cst_7 = arith.constant 1.000000e+00 : f32
    %11 = vector.broadcast %cst_7 : f32 to vector<2x128xf32>
    %12 = arith.divf %11, %10 : vector<2x128xf32>
    %c0_8 = arith.constant 0 : index
    %c0_9 = arith.constant 0 : index
    %13 = vector.load %arg4[%c0_8, %c0_9] : memref<2x128xf32, #tpu.memory_space<vmem>>, vector<2x128xf32>
    tpu.vector_store %arg4[%c0_8, %c0_9], %12 {strides = array<i32>} : memref<2x128xf32, #tpu.memory_space<vmem>>, vector<2x128xf32>,
    return
  }
  func.func @transform_0(%arg0: i32) -> (i32, i32) {
    %c0_i32 = arith.constant 0 : i32
    %c0_i32_0 = arith.constant 0 : i32
    return %arg0, %c0_i32 : i32, i32
  }
  func.func @transform_1(%arg0: i32) -> (i32, i32) {
    %c0_i32 = arith.constant 0 : i32
    %c0_i32_0 = arith.constant 0 : i32
    %c0_i32_1 = arith.constant 0 : i32
    return %c0_i32, %c0_i32_0 : i32, i32
  }
  func.func @transform_2(%arg0: i32) -> (i32, i32) {
    %c0_i32 = arith.constant 0 : i32
    %c0_i32_0 = arith.constant 0 : i32
    %c0_i32_1 = arith.constant 0 : i32
    return %c0_i32, %c0_i32_0 : i32, i32
  }
  func.func @transform_3(%arg0: i32) -> (i32, i32) {
    %c0_i32 = arith.constant 0 : i32
    %c0_i32_0 = arith.constant 0 : i32
    return %arg0, %c0_i32 : i32, i32
  }
}

</mosaic_0001>

<bundles_post_ra>
// kernel: logistic_regression.1
= control target key start
LH: loop header
LB: loop body
LE: loop exit
PB: predicated region body
PF: predicated region fallthrough
CT: control target
= control target key end

     0   :  { %v798_v47 = vmov 1983009808   ;;  %v158_v49 = vlaneseq  ;;  %s1236_s0 = inlined_call_operand.vmem [shape: f32[2,1024], index: 0, kind: input, shape index: {}]   ;;  %s1237_s1 = inlined_call_operand.vmem [shape: f32[1024,128], index: 1, kind: input, shape index: {}]   ;;  %s1238_s2 = inlined_call_operand.vmem [shape: f32[1,128], index: 2, kind: input, shape index: {}]   ;;  %s1239_s3 = inlined_call_operand.hbm [shape: f32[2,128], index: 3, kind: output, shape index: {}]  }
   0x1   :  { %v33_v0 = vld [vmem:[%s1237_s1 + $0x80] sm:$0xff]  ;;  %v34_v1 = vld [vmem:[%s1237_s1 + $0x88] sm:$0xff]  ;;  %v35_v11 = vld [vmem:[%s1237_s1 + $0x90] sm:$0xff]  ;;  %v156_v48 = vunpack.c.l.s4 %v798_v47 }
   0x2   :  { %v17_v2 = vld [vmem:[%s1237_s1] sm:$0xff]  ;;  %v638_v3 = vpack.c.bf16 %v34_v1, %v33_v0  ;;  %v18_v4 = vld [vmem:[%s1237_s1 + $0x8] sm:$0xff]  ;;  %v36_v13 = vld [vmem:[%s1237_s1 + $0x98] sm:$0xff]  ;;  %v159_v0 = vshrl.u32 %v158_v49, 7 }
   0x3   :  { %v65_v5 = vld [vmem:[%s1237_s1 + $0x180] sm:$0xff]  ;;  %v66_v6 = vld [vmem:[%s1237_s1 + $0x188] sm:$0xff]  ;;  %v640_v7 = vpack.c.bf16 %v18_v4, %v17_v2  ;;  %v19_v14 = vld [vmem:[%s1237_s1 + $0x10] sm:$0xff]  ;;  %v642_v16 = vpack.c.bf16 %v36_v13, %v35_v11  ;;  %v157_v63 = vunpack.c.0.s8 %v156_v48 }
   0x4   :  { %v670_v8 = vpack.c.bf16 %v66_v6, %v65_v5  ;;  %v49_v9 = vld [vmem:[%s1237_s1 + $0x100] sm:$0xff]  ;;  %v50_v10 = vld [vmem:[%s1237_s1 + $0x108] sm:$0xff]  ;;  %639 = vmatprep.subr.bf16.mxu0 %v638_v3  ;;  %v20_v15 = vld [vmem:[%s1237_s1 + $0x18] sm:$0xff] }
   0x5   :  { %v672_v12 = vpack.c.bf16 %v50_v10, %v49_v9  ;;  %641 = vmatpush3.bf16.msra.mxu0 %v640_v7  ;;  %v644_v17 = vpack.c.bf16 %v20_v15, %v19_v14  ;;  %v67_v18 = vld [vmem:[%s1237_s1 + $0x190] sm:$0xff]  ;;  %v68_v19 = vld [vmem:[%s1237_s1 + $0x198] sm:$0xff]  ;;  %v37_v23 = vld [vmem:[%s1237_s1 + $0xa0] sm:$0xff]  ;;  %v970_v13 = vsub.s32 %v157_v63, %v159_v0 }
   0x6   :  { %671 = vmatprep.subr.bf16.mxu1 %v670_v8  ;;  %v51_v20 = vld [vmem:[%s1237_s1 + $0x110] sm:$0xff]  ;;  %v674_v21 = vpack.c.bf16 %v68_v19, %v67_v18  ;;  %v52_v22 = vld [vmem:[%s1237_s1 + $0x118] sm:$0xff]  ;;  %v38_v24 = vld [vmem:[%s1237_s1 + $0xa8] sm:$0xff]  ;;  %643 = vmatprep.subr.bf16.mxu0 %v642_v16 }
   0x7   :  { %673 = vmatpush3.bf16.msra.mxu1 %v672_v12  ;;  %v676_v25 = vpack.c.bf16 %v52_v22, %v51_v20  ;;  %v646_v26 = vpack.c.bf16 %v38_v24, %v37_v23  ;;  %v21_v27 = vld [vmem:[%s1237_s1 + $0x20] sm:$0xff]  ;;  %v22_v28 = vld [vmem:[%s1237_s1 + $0x28] sm:$0xff]  ;;  %v39_v35 = vld [vmem:[%s1237_s1 + $0xb0] sm:$0xff] }
   0x8   :  { %v69_v29 = vld [vmem:[%s1237_s1 + $0x1a0] sm:$0xff]  ;;  %675 = vmatprep.subr.bf16.mxu1 %v674_v21  ;;  %v70_v30 = vld [vmem:[%s1237_s1 + $0x1a8] sm:$0xff]  ;;  %v648_v33 = vpack.c.bf16 %v22_v28, %v21_v27  ;;  %v40_v36 = vld [vmem:[%s1237_s1 + $0xb8] sm:$0xff] }
   0x9   :  { %v53_v31 = vld [vmem:[%s1237_s1 + $0x120] sm:$0xff]  ;;  %v54_v32 = vld [vmem:[%s1237_s1 + $0x128] sm:$0xff]  ;;  %645 = vmatpush3.bf16.msra.mxu0 %v644_v17  ;;  %v678_v34 = vpack.c.bf16 %v70_v30, %v69_v29  ;;  %v23_v37 = vld [vmem:[%s1237_s1 + $0x30] sm:$0xff]  ;;  %v650_v39 = vpack.c.bf16 %v40_v36, %v39_v35 }
   0xa   :  { %647 = vmatprep.subr.bf16.mxu0 %v646_v26  ;;  %v680_v38 = vpack.c.bf16 %v54_v32, %v53_v31  ;;  %v24_v40 = vld [vmem:[%s1237_s1 + $0x38] sm:$0xff]  ;;  %v71_v41 = vld [vmem:[%s1237_s1 + $0x1b0] sm:$0xff]  ;;  %v41_v46 = vld [vmem:[%s1237_s1 + $0xc0] sm:$0xff] }
   0xb   :  { %677 = vmatpush3.bf16.msra.mxu1 %v676_v25  ;;  %v72_v42 = vld [vmem:[%s1237_s1 + $0x1b8] sm:$0xff]  ;;  %v55_v44 = vld [vmem:[%s1237_s1 + $0x130] sm:$0xff]  ;;  %v42_v50 = vld [vmem:[%s1237_s1 + $0xc8] sm:$0xff]  ;;  %v652_v51 = vpack.c.bf16 %v24_v40, %v23_v37 }
   0xc   :  { %679 = vmatprep.subr.bf16.mxu1 %v678_v34  ;;  %v682_v43 = vpack.c.bf16 %v72_v42, %v71_v41  ;;  %v56_v45 = vld [vmem:[%s1237_s1 + $0x138] sm:$0xff]  ;;  %v73_v52 = vld [vmem:[%s1237_s1 + $0x1c0] sm:$0xff]  ;;  %v74_v53 = vld [vmem:[%s1237_s1 + $0x1c8] sm:$0xff]  ;;  %v654_v55 = vpack.c.bf16 %v42_v50, %v41_v46 }
   0xd   :  { %649 = vmatpush3.bf16.msra.mxu0 %v648_v33  ;;  %v684_v54 = vpack.c.bf16 %v56_v45, %v55_v44  ;;  %v25_v56 = vld [vmem:[%s1237_s1 + $0x40] sm:$0xff]  ;;  %v26_v57 = vld [vmem:[%s1237_s1 + $0x48] sm:$0xff]  ;;  %v686_v59 = vpack.c.bf16 %v74_v53, %v73_v52  ;;  %v43_v61 = vld [vmem:[%s1237_s1 + $0xd0] sm:$0xff] }
   0xe   :  { %651 = vmatprep.subr.bf16.mxu0 %v650_v39  ;;  %v57_v58 = vld [vmem:[%s1237_s1 + $0x140] sm:$0xff]  ;;  %v58_v60 = vld [vmem:[%s1237_s1 + $0x148] sm:$0xff]  ;;  %v44_v62 = vld [vmem:[%s1237_s1 + $0xd8] sm:$0xff]  ;;  %v656_v3 = vpack.c.bf16 %v26_v57, %v25_v56 }
   0xf   :  { %681 = vmatpush3.bf16.msra.mxu1 %v680_v38  ;;  %v75_v1 = vld [vmem:[%s1237_s1 + $0x1d0] sm:$0xff]  ;;  %v76_v2 = vld [vmem:[%s1237_s1 + $0x1d8] sm:$0xff]  ;;  %v688_v4 = vpack.c.bf16 %v58_v60, %v57_v58  ;;  %v658_v5 = vpack.c.bf16 %v44_v62, %v43_v61  ;;  %v45_v11 = vld [vmem:[%s1237_s1 + $0xe0] sm:$0xff] }
  0x10   :  { %683 = vmatprep.subr.bf16.mxu1 %v682_v43  ;;  %v27_v6 = vld [vmem:[%s1237_s1 + $0x50] sm:$0xff]  ;;  %v28_v7 = vld [vmem:[%s1237_s1 + $0x58] sm:$0xff]  ;;  %v690_v9 = vpack.c.bf16 %v76_v2, %v75_v1  ;;  %v46_v12 = vld [vmem:[%s1237_s1 + $0xe8] sm:$0xff] }
  0x11   :  { %653 = vmatpush3.bf16.msra.mxu0 %v652_v51  ;;  %v59_v8 = vld [vmem:[%s1237_s1 + $0x150] sm:$0xff]  ;;  %v60_v10 = vld [vmem:[%s1237_s1 + $0x158] sm:$0xff]  ;;  %v77_v14 = vld [vmem:[%s1237_s1 + $0x1e0] sm:$0xff]  ;;  %v660_v16 = vpack.c.bf16 %v28_v7, %v27_v6  ;;  %v662_v19 = vpack.c.bf16 %v46_v12, %v45_v11 }
  0x12   :  { %655 = vmatprep.subr.bf16.mxu0 %v654_v55  ;;  %v78_v15 = vld [vmem:[%s1237_s1 + $0x1e8] sm:$0xff]  ;;  %v29_v17 = vld [vmem:[%s1237_s1 + $0x60] sm:$0xff]  ;;  %v692_v18 = vpack.c.bf16 %v60_v10, %v59_v8  ;;  %v47_v25 = vld [vmem:[%s1237_s1 + $0xf0] sm:$0xff] }
  0x13   :  { %685 = vmatpush3.bf16.msra.mxu1 %v684_v54  ;;  %v30_v20 = vld [vmem:[%s1237_s1 + $0x68] sm:$0xff]  ;;  %v61_v21 = vld [vmem:[%s1237_s1 + $0x160] sm:$0xff]  ;;  %v694_v23 = vpack.c.bf16 %v78_v15, %v77_v14  ;;  %v48_v26 = vld [vmem:[%s1237_s1 + $0xf8] sm:$0xff] }
  0x14   :  { %687 = vmatprep.subr.bf16.mxu1 %v686_v59  ;;  %v15_v22 = vld [vmem:[%s1236_s0] sm:$0xff]  ;;  %v62_v24 = vld [vmem:[%s1237_s1 + $0x168] sm:$0xff]  ;;  %v79_v29 = vld [vmem:[%s1237_s1 + $0x1f0] sm:$0xff]  ;;  %v664_v31 = vpack.c.bf16 %v30_v20, %v29_v17  ;;  %v666_v35 = vpack.c.bf16 %v48_v26, %v47_v25 }
  0x15   :  { %657 = vmatpush3.bf16.msra.mxu0 %v656_v3  ;;  %v161_v27 = vrot.slane %v15_v22, %v970_v13  ;;  %v154_v28 = vcombine.high %v15_v22, %v15_v22  ;;  %v80_v30 = vld [vmem:[%s1237_s1 + $0x1f8] sm:$0xff]  ;;  %v696_v34 = vpack.c.bf16 %v62_v24, %v61_v21  ;;  %v31_v36 = vld [vmem:[%s1237_s1 + $0x70] sm:$0xff]  ;;  %v97_v41 = vld [vmem:[%s1237_s1 + $0x280] sm:$0xff] }
  0x16   :  { %659 = vmatprep.subr.bf16.mxu0 %v658_v5  ;;  %v32_v37 = vld [vmem:[%s1237_s1 + $0x78] sm:$0xff]  ;;  %v63_v38 = vld [vmem:[%s1237_s1 + $0x170] sm:$0xff]  ;;  %v698_v39 = vpack.c.bf16 %v80_v30, %v79_v29  ;;  %v98_v42 = vld [vmem:[%s1237_s1 + $0x288] sm:$0xff] }
  0x17   :  { %689 = vmatpush3.bf16.msra.mxu1 %v688_v4  ;;  %v169_v32 = vcombine.high %v161_v27, %v161_v27  ;;  %v168_v33 = vrot.slane %v154_v28, %v970_v13  ;;  %v64_v40 = vld [vmem:[%s1237_s1 + $0x178] sm:$0xff]  ;;  %v129_v44 = vld [vmem:[%s1237_s1 + $0x380] sm:$0xff]  ;;  %v130_v45 = vld [vmem:[%s1237_s1 + $0x388] sm:$0xff]  ;;  %v668_v46 = vpack.c.bf16 %v32_v37, %v31_v36  ;;  %v702_v48 = vpack.c.bf16 %v98_v42, %v97_v41 }
  0x18   :  { %691 = vmatprep.subr.bf16.mxu1 %v690_v9  ;;  %v700_v47 = vpack.c.bf16 %v64_v40, %v63_v38  ;;  %v81_v49 = vld [vmem:[%s1237_s1 + $0x200] sm:$0xff]  ;;  %v82_v50 = vld [vmem:[%s1237_s1 + $0x208] sm:$0xff]  ;;  %v734_v52 = vpack.c.bf16 %v130_v45, %v129_v44  ;;  %v99_v54 = vld [vmem:[%s1237_s1 + $0x290] sm:$0xff] }
  0x19   :  { %661 = vmatpush3.bf16.msra.mxu0 %v660_v16  ;;  %260 = vmatprep.mubr.f32.mxu0 %v169_v32  ;;  %v170_v43 = vcombine.high %v168_v33, %v168_v33  ;;  %v113_v51 = vld [vmem:[%s1237_s1 + $0x300] sm:$0xff]  ;;  %v114_v53 = vld [vmem:[%s1237_s1 + $0x308] sm:$0xff]  ;;  %v100_v55 = vld [vmem:[%s1237_s1 + $0x298] sm:$0xff]  ;;  %v704_v58 = vpack.c.bf16 %v82_v50, %v81_v49 }
  0x1a   :  { %663 = vmatprep.subr.bf16.mxu0 %v662_v19  ;;  %v131_v56 = vld [vmem:[%s1237_s1 + $0x390] sm:$0xff]  ;;  %v132_v57 = vld [vmem:[%s1237_s1 + $0x398] sm:$0xff]  ;;  %v736_v59 = vpack.c.bf16 %v114_v53, %v113_v51  ;;  %v706_v60 = vpack.c.bf16 %v100_v55, %v99_v54  ;;  %v101_v2 = vld [vmem:[%s1237_s1 + $0x2a0] sm:$0xff] }
  0x1b   :  { %693 = vmatpush3.bf16.msra.mxu1 %v692_v18  ;;  %330 = vmatprep.mubr.f32.mxu1 %v170_v43  ;;  %v83_v61 = vld [vmem:[%s1237_s1 + $0x210] sm:$0xff]  ;;  %v84_v62 = vld [vmem:[%s1237_s1 + $0x218] sm:$0xff]  ;;  %v738_v0 = vpack.c.bf16 %v132_v57, %v131_v56  ;;  %v102_v3 = vld [vmem:[%s1237_s1 + $0x2a8] sm:$0xff] }
  0x1c   :  { %695 = vmatprep.subr.bf16.mxu1 %v694_v23  ;;  %v115_v63 = vld [vmem:[%s1237_s1 + $0x310] sm:$0xff]  ;;  %v116_v1 = vld [vmem:[%s1237_s1 + $0x318] sm:$0xff]  ;;  %v133_v4 = vld [vmem:[%s1237_s1 + $0x3a0] sm:$0xff]  ;;  %v708_v6 = vpack.c.bf16 %v84_v62, %v83_v61  ;;  %v710_v8 = vpack.c.bf16 %v102_v3, %v101_v2 }
  0x1d   :  { %665 = vmatpush3.bf16.msra.mxu0 %v664_v31  ;;  %v134_v5 = vld [vmem:[%s1237_s1 + $0x3a8] sm:$0xff]  ;;  %v740_v7 = vpack.c.bf16 %v116_v1, %v115_v63  ;;  %v85_v9 = vld [vmem:[%s1237_s1 + $0x220] sm:$0xff]  ;;  %v103_v15 = vld [vmem:[%s1237_s1 + $0x2b0] sm:$0xff] }
  0x1e   :  { %667 = vmatprep.subr.bf16.mxu0 %v666_v35  ;;  %v86_v10 = vld [vmem:[%s1237_s1 + $0x228] sm:$0xff]  ;;  %v117_v11 = vld [vmem:[%s1237_s1 + $0x320] sm:$0xff]  ;;  %v742_v12 = vpack.c.bf16 %v134_v5, %v133_v4  ;;  %v104_v16 = vld [vmem:[%s1237_s1 + $0x2b8] sm:$0xff] }
  0x1f   :  { %697 = vmatpush3.bf16.msra.mxu1 %v696_v34  ;;  %v118_v14 = vld [vmem:[%s1237_s1 + $0x328] sm:$0xff]  ;;  %v135_v17 = vld [vmem:[%s1237_s1 + $0x3b0] sm:$0xff]  ;;  %v136_v18 = vld [vmem:[%s1237_s1 + $0x3b8] sm:$0xff]  ;;  %v712_v19 = vpack.c.bf16 %v86_v10, %v85_v9  ;;  %v714_v22 = vpack.c.bf16 %v104_v16, %v103_v15 }
  0x20   :  { %699 = vmatprep.subr.bf16.mxu1 %v698_v39  ;;  %v87_v20 = vld [vmem:[%s1237_s1 + $0x230] sm:$0xff]  ;;  %v744_v21 = vpack.c.bf16 %v118_v14, %v117_v11  ;;  %v88_v23 = vld [vmem:[%s1237_s1 + $0x238] sm:$0xff]  ;;  %v746_v26 = vpack.c.bf16 %v136_v18, %v135_v17  ;;  %v106_v28 = vld [vmem:[%s1237_s1 + $0x2c8] sm:$0xff] }
  0x21   :  { %669 = vmatpush3.bf16.msra.mxu0 %v668_v46  ;;  %v119_v24 = vld [vmem:[%s1237_s1 + $0x330] sm:$0xff]  ;;  %v120_v25 = vld [vmem:[%s1237_s1 + $0x338] sm:$0xff]  ;;  %v137_v29 = vld [vmem:[%s1237_s1 + $0x3c0] sm:$0xff] }
  0x22   :  { %703 = vmatprep.subr.bf16.mxu0 %v702_v48  ;;  %v138_v30 = vld [vmem:[%s1237_s1 + $0x3c8] sm:$0xff] }
  0x23   :  { %701 = vmatpush3.bf16.msra.mxu1 %v700_v47  ;;  %v16_v31 = vld [vmem:[%s1236_s0 + $0x8] sm:$0xff] }
  0x24   :  { %735 = vmatprep.subr.bf16.mxu1 %v734_v52  ;;  %261 = vmatmul.mubr.f32.vlgmr.msra.gmra.mrb[0].mxu0 %v161_v27  ;;  %v105_v27 = vld [vmem:[%s1237_s1 + $0x2c0] sm:$0xff] }
  0x25   :  { %705 = vmatpush3.bf16.msra.mxu0 %v704_v58 }
  0x26   :  { %331 = vmatmul.mubr.f32.vlgmr.msra.gmra.mrb[0].mxu1 %v168_v33  ;;  %707 = vmatprep.subr.bf16.mxu0 %v706_v60 }
  0x27   :  { %737 = vmatpush3.bf16.msra.mxu1 %v736_v59 }
  0x28   :  { %739 = vmatprep.subr.bf16.mxu1 %v738_v0 }
  0x29   :  { %709 = vmatpush3.bf16.msra.mxu0 %v708_v6 }
  0x2a   :  { %711 = vmatprep.subr.bf16.mxu0 %v710_v8 }
  0x2b   :  { %741 = vmatpush3.bf16.msra.mxu1 %v740_v7 }
  0x2c   :  { %743 = vmatprep.subr.bf16.mxu1 %v742_v12 }
  0x2d   :  { %8 = vsyncpa [#allocation3], 0  ;;  %713 = vmatpush3.bf16.msra.mxu0 %v712_v19  ;;  %v716_v32 = vpack.c.bf16 %v88_v23, %v87_v20  ;;  %v1131_v33 = vrot.slane %v16_v31, %v970_v13  ;;  %v171_v34 = vcombine.high %v16_v31, %v16_v31  ;;  %v748_v35 = vpack.c.bf16 %v120_v25, %v119_v24  ;;  %v89_v37 = vld [vmem:[%s1237_s1 + $0x240] sm:$0xff]  ;;  %v90_v38 = vld [vmem:[%s1237_s1 + $0x248] sm:$0xff] }
  0x2e   :  { %715 = vmatprep.subr.bf16.mxu0 %v714_v22  ;;  %v718_v36 = vpack.c.bf16 %v106_v28, %v105_v27  ;;  %v121_v39 = vld [vmem:[%s1237_s1 + $0x340] sm:$0xff]  ;;  %v750_v40 = vpack.c.bf16 %v138_v30, %v137_v29  ;;  %v122_v41 = vld [vmem:[%s1237_s1 + $0x348] sm:$0xff]  ;;  %v107_v42 = vld [vmem:[%s1237_s1 + $0x2d0] sm:$0xff]  ;;  %v720_v48 = vpack.c.bf16 %v90_v38, %v89_v37 }
  0x2f   :  { %745 = vmatpush3.bf16.msra.mxu1 %v744_v21  ;;  %v108_v43 = vld [vmem:[%s1237_s1 + $0x2d8] sm:$0xff]  ;;  %v186_v44 = vcombine.high %v1131_v33, %v1131_v33  ;;  %v185_v45 = vrot.slane %v171_v34, %v970_v13  ;;  %v139_v46 = vld [vmem:[%s1237_s1 + $0x3d0] sm:$0xff]  ;;  %v752_v50 = vpack.c.bf16 %v122_v41, %v121_v39  ;;  %v109_v56 = vld [vmem:[%s1237_s1 + $0x2e0] sm:$0xff] }
  0x30   :  { %747 = vmatprep.subr.bf16.mxu1 %v746_v26  ;;  %v140_v47 = vld [vmem:[%s1237_s1 + $0x3d8] sm:$0xff]  ;;  %v722_v51 = vpack.c.bf16 %v108_v43, %v107_v42  ;;  %v91_v13 = vld [vmem:[%s1237_s1 + $0x250] sm:$0xff]  ;;  %v110_v57 = vld [vmem:[%s1237_s1 + $0x2e8] sm:$0xff] }
  0x31   :  { %717 = vmatpush3.bf16.msra.mxu0 %v716_v32  ;;  %400 = vmatprep.mubr.f32.mxu0 %v186_v44  ;;  %v187_v49 = vcombine.high %v185_v45, %v185_v45  ;;  %v92_v52 = vld [vmem:[%s1237_s1 + $0x258] sm:$0xff]  ;;  %v123_v53 = vld [vmem:[%s1237_s1 + $0x350] sm:$0xff]  ;;  %v754_v54 = vpack.c.bf16 %v140_v47, %v139_v46  ;;  %v141_v58 = vld [vmem:[%s1237_s1 + $0x3e0] sm:$0xff]  ;;  %v726_v62 = vpack.c.bf16 %v110_v57, %v109_v56 }
  0x32   :  { %719 = vmatprep.subr.bf16.mxu0 %v718_v36  ;;  %v124_v55 = vld [vmem:[%s1237_s1 + $0x358] sm:$0xff]  ;;  %v142_v59 = vld [vmem:[%s1237_s1 + $0x3e8] sm:$0xff]  ;;  %v724_v60 = vpack.c.bf16 %v92_v52, %v91_v13  ;;  %v93_v63 = vld [vmem:[%s1237_s1 + $0x260] sm:$0xff] }
  0x33   :  { %749 = vmatpush3.bf16.msra.mxu1 %v748_v35  ;;  %470 = vmatprep.mubr.f32.mxu1 %v187_v49  ;;  %v756_v61 = vpack.c.bf16 %v124_v55, %v123_v53  ;;  %v94_v0 = vld [vmem:[%s1237_s1 + $0x268] sm:$0xff]  ;;  %v125_v1 = vld [vmem:[%s1237_s1 + $0x360] sm:$0xff]  ;;  %v758_v2 = vpack.c.bf16 %v142_v59, %v141_v58  ;;  %v111_v4 = vld [vmem:[%s1237_s1 + $0x2f0] sm:$0xff] }
  0x34   :  { %751 = vmatprep.subr.bf16.mxu1 %v750_v40  ;;  %v126_v3 = vld [vmem:[%s1237_s1 + $0x368] sm:$0xff]  ;;  %v112_v5 = vld [vmem:[%s1237_s1 + $0x2f8] sm:$0xff]  ;;  %v143_v6 = vld [vmem:[%s1237_s1 + $0x3f0] sm:$0xff]  ;;  %v728_v8 = vpack.c.bf16 %v94_v0, %v93_v63 }
  0x35   :  { %721 = vmatpush3.bf16.msra.mxu0 %v720_v48  ;;  %v144_v7 = vld [vmem:[%s1237_s1 + $0x3f8] sm:$0xff]  ;;  %v760_v9 = vpack.c.bf16 %v126_v3, %v125_v1  ;;  %v730_v10 = vpack.c.bf16 %v112_v5, %v111_v4  ;;  %v95_v11 = vld [vmem:[%s1237_s1 + $0x270] sm:$0xff]  ;;  %v497_v20 = vld [vmem:[%s1238_s2] ss:$0 sm:$0xff] }
  0x36   :  { %723 = vmatprep.subr.bf16.mxu0 %v722_v51  ;;  %v96_v12 = vld [vmem:[%s1237_s1 + $0x278] sm:$0xff]  ;;  %v762_v14 = vpack.c.bf16 %v144_v7, %v143_v6  ;;  %v127_v15 = vld [vmem:[%s1237_s1 + $0x370] sm:$0xff] }
  0x37   :  { %753 = vmatpush3.bf16.msra.mxu1 %v752_v50  ;;  %v128_v16 = vld [vmem:[%s1237_s1 + $0x378] sm:$0xff]  ;;  %v732_v17 = vpack.c.bf16 %v96_v12, %v95_v11  ;;  %s799_s1 = smov [#allocation2]  }
  0x38   :  { %755 = vmatprep.subr.bf16.mxu1 %v754_v54  ;;  %v764_v18 = vpack.c.bf16 %v128_v16, %v127_v15  ;;  %s489_s2 = sshll.u32 %s799_s1, 4  ;;  %s490_s2 = int_to_ptr.vmem [resolvable:$true] %s489_s2 }
  0x39   :  { %725 = vmatpush3.bf16.msra.mxu0 %v724_v60  ;;  %s774_s29 = scalar_lea.vmem %s490_s2, 32  ;;  %p779_p1 = scmp.lt.s32.totalorder %s490_s2, %s490_s2 }
  0x3a   :  { %727 = vmatprep.subr.bf16.mxu0 %v726_v62  ;;  %p775_p0 = scmp.ne.s32.totalorder %s490_s2, %s774_s29  ;;  %p780_p2 = scmp.lt.s32.totalorder %s774_s29, %s774_s29 }
  0x3b   :  { %757 = vmatpush3.bf16.msra.mxu1 %v756_v61 }
  0x3c   :  { %759 = vmatprep.subr.bf16.mxu1 %v758_v2  ;;  %p781_p3 = por %p780_p2, %p779_p1 }
  0x3d   :  { %729 = vmatpush3.bf16.msra.mxu0 %v728_v8 }
  0x3e   :  { %731 = vmatprep.subr.bf16.mxu0 %v730_v10  ;;  %p782_p4 = pnand %p781_p3, %p775_p0 }
  0x3f   :  { %761 = vmatpush3.bf16.msra.mxu1 %v760_v9 }
  0x40   :  { %763 = vmatprep.subr.bf16.mxu1 %v762_v14 }
  0x41   :  { %733 = vmatpush3.bf16.msra.mxu0 %v732_v17 }
  0x43   :  { %765 = vmatpush3.bf16.msra.mxu1 %v764_v18 }
  0x44   :  { %401 = vmatmul.mubr.f32.vlgmr.msra.gmra.mrb[2].mxu0 %v1131_v33 }
  0x46   :  { %471 = vmatmul.mubr.f32.vlgmr.msra.gmra.mrb[2].mxu1 %v185_v45 }
  0xf7   :  { %v530_v19 = vpop.f32.mrb[0].mxu0 }
  0xf8   :  { %v531_v21 = vpop.f32.mrb[1].mxu0 }
  0xf9   :  { %v565_v22 = vpop.f32.mrb[0].mxu1  ;;  %v532_v23 = vadd.f32 %v531_v21, %v530_v19 }
  0xfa   :  { %v566_v24 = vpop.f32.mrb[1].mxu1 }
  0xfb   :  { %v567_v25 = vadd.f32 %v566_v24, %v565_v22  ;;  %v263_v26 = vadd.f32 %v532_v23, %v497_v20 }
  0xfd   :  { %v333_v27 = vadd.f32 %v567_v25, %v263_v26 }
 0x117   :  { %v600_v28 = vpop.f32.mrb[2].mxu0 }
 0x118   :  { %v601_v29 = vpop.f32.mrb[3].mxu0 }
 0x119   :  { %v635_v30 = vpop.f32.mrb[2].mxu1  ;;  %v602_v31 = vadd.f32 %v601_v29, %v600_v28 }
 0x11a   :  { %v636_v32 = vpop.f32.mrb[3].mxu1 }
 0x11b   :  { %v637_v34 = vadd.f32 %v636_v32, %v635_v30  ;;  %v403_v33 = vadd.f32 %v602_v31, %v333_v27 }
 0x11d   :  { %v473_v35 = vadd.f32 %v637_v34, %v403_v33 }
 0x11f   :  { %v476_v36 = vsub.f32 0.0, %v473_v35 }
 0x121   :  { %v477_v37 = vmul.f32 1.442695, %v476_v36 }
 0x123   :  { %770 = vpow2.f32 %v477_v37 }
 0x12d   :  { %v771_v38 = vpop.eup %770 }
 0x12e   :  { %v479_v39 = vadd.f32 1.0, %v771_v38 }
 0x130   :  { %772 = vrcp.f32 %v479_v39 }
 0x13a   :  { %v773_v40 = vpop.eup %772 }
 0x13b   :  { %482 = vst [vmem:[#allocation2] sm:$0x3] %v773_v40 }
 0x13c   :  { %785 = shalt.err (!%p782_p4)
}
 0x13d   :  { %s786_s4 = scalar_lea.hbm %s1239_s3, 32 }
 0x13e   :  { %p787_p5 = scmp.ne.s32.totalorder %s1239_s3, %s786_s4  ;;  %p790_p6 = scmp.lt.u32.totalorder %s786_s4, %s1239_s3 }
 0x140   :  { %p792_p7 = pnand %p790_p6, %p787_p5 }
 0x142   :  { %795 = shalt.err (!%p792_p7)
}
 0x143   :  { %492 = dma.vmem_to_hbm [thread:$0]  %s490_s2, 32, %s1239_s3, [#allocation3]  }
 0x144   :  { %796 = dma.done.wait [#allocation3], 32  }
 0x145   :  { %797 = vsyncadd [#allocation3], 4294967264 }
 0x146   :  { %496 = vsyncpa [#allocation3], 1 }

</bundles_post_ra>
